<compile_context>
chip_gen: v7x
topology: tpu7x:2x2x1
jax: 0.10.0
libtpu: 0.0.40
codegen_flags: <defaults>
</compile_context>

<pallas_src>
import functools

import jax
import jax.numpy as jnp
from jax import lax
from jax.experimental import pallas as pl
from jax.experimental.pallas import tpu as pltpu


def _add_scale_embs_kernel(pos_ref, x_ref, emb_ref, o_ref, *, num_scales, use_mxu):
    # pos_ref : VMEM (s_tile, 1) int32
    # x_ref   : VMEM (s_tile, D)
    # emb_ref : VMEM (NS, D)       (full scale-embedding table)
    # o_ref   : VMEM (s_tile, D)
    pos = pos_ref[...]                                   # (s_tile, 1) int32
    acc = x_ref[...].astype(jnp.float32)                 # (s_tile, D) f32

    if use_mxu:
        # Exact gather as a one-hot MXU matmul (only used for large NS).
        s_tile = x_ref.shape[0]
        iota = lax.broadcasted_iota(jnp.int32, (s_tile, num_scales), 1)
        onehot = (pos == iota).astype(emb_ref.dtype)     # (s_tile, NS)
        acc = acc + jnp.dot(onehot, emb_ref[...],
                            preferred_element_type=jnp.float32)
    else:
        # Small NS: fused VPU select-accumulate, no intermediate gather buffer.
        emb = emb_ref[...].astype(jnp.float32)           # (NS, D)
        for ns_idx in range(num_scales):                 # static unroll (NS small)
            row = emb[ns_idx:ns_idx + 1, :]              # (1, D) static slice
            acc = acc + jnp.where(pos == ns_idx, row, 0.0)

    o_ref[...] = acc.astype(o_ref.dtype)


def _pick_s_tile(num_rows, d, itemsize, target_bytes=1 * 1024 * 1024):
    """Largest power-of-two multiple of the dtype-native sublane count whose
    (s_tile, D) block stays around ~1 MiB.  HBM-bound streaming plateaus there;
    smaller tiles leave VMEM headroom on v7x and give more grid steps for
    pipelining / megacore sharding."""
    min_rows = {4: 8, 2: 16, 1: 32}.get(itemsize, 8)
    cap = max(min_rows, target_bytes // max(1, d * itemsize))
    t = min_rows
    while t * 2 <= cap:
        t *= 2
    # Never exceed the (sublane-padded) total row count.
    rows_padded = ((num_rows + min_rows - 1) // min_rows) * min_rows
    return min(t, rows_padded)


def add_scale_embs(inputs, inputs_scale_positions, scale_emb, *, s_tile=None):
    """inputs: (B, S, D); inputs_scale_positions: (B, S) int; scale_emb: (NS, D)."""
    B, S, D = inputs.shape
    NS = scale_emb.shape[0]
    R = B * S                                            # flattened row count

    itemsize = jnp.dtype(inputs.dtype).itemsize
    if s_tile is None:
        s_tile = _pick_s_tile(R, D, itemsize)

    # Flatten to row-major 2-D: 1-D grid over contiguous row tiles.
    x2d = inputs.reshape(R, D)
    pos2d = inputs_scale_positions.astype(jnp.int32).reshape(R, 1)

    grid = (pl.cdiv(R, s_tile),)
    use_mxu = NS > 16

    grid_spec = pltpu.PrefetchScalarGridSpec(
        num_scalar_prefetch=0,
        grid=grid,
        in_specs=[
            pl.BlockSpec((s_tile, 1), lambda r: (r, 0)),   # positions
            pl.BlockSpec((s_tile, D), lambda r: (r, 0)),   # inputs tile
            pl.BlockSpec((NS, D), lambda r: (0, 0)),       # full table (constant)
        ],
        out_specs=pl.BlockSpec((s_tile, D), lambda r: (r, 0)),
    )

    out2d = pl.pallas_call(
        functools.partial(_add_scale_embs_kernel, num_scales=NS, use_mxu=use_mxu),
        out_shape=jax.ShapeDtypeStruct((R, D), inputs.dtype),
        grid_spec=grid_spec,
        compiler_params=pltpu.CompilerParams(
            dimension_semantics=("parallel",),
            # ~75% of v7x physical VMEM; plenty (per-step usage is a few MiB)
            # and safely below physical on all generations.
            vmem_limit_bytes=48 * 1024 * 1024,
        ),
    )(pos2d, x2d, scale_emb)

    return out2d.reshape(B, S, D)


if __name__ == "__main__":
    key = jax.random.PRNGKey(0)
    k_emb, k_in, k_pos = jax.random.split(key, 3)

    num_scales = 4
    dim = 128            # lane-dense last dim -> unmasked full-width stores
    B, S = 2, 8

    # Deterministic parameter init mirroring nn.init.normal_(std=0.02) on (num_scales, dim).
    scale_emb = 0.02 * jax.random.normal(k_emb, (num_scales, dim), dtype=jnp.float32)
    inputs = jax.random.normal(k_in, (B, S, dim), dtype=jnp.float32)
    inputs_scale_positions = jax.random.randint(k_pos, (B, S), 0, num_scales, dtype=jnp.int32)

    out = add_scale_embs(inputs, inputs_scale_positions, scale_emb)
    out = jax.block_until_ready(out)

    # Reference (plain JAX) check of the PyTorch semantics.
    ref = inputs + scale_emb[inputs_scale_positions]
    assert out.shape == ref.shape and out.dtype == ref.dtype
    assert jnp.allclose(out, ref, atol=1e-6, rtol=1e-6)

    print("KERNEL_OK")
</pallas_src>

<mosaic_0001>
module attributes {stable_mosaic.version = 11 : i64} {
  func.func @_add_scale_embs_kernel(%arg0: i32, %arg1: memref<16x1xi32, #tpu.memory_space<vmem>>, %arg2: memref<16x128xf32, #tpu.memory_space<vmem>>, %arg3: memref<4x128xf32, #tpu.memory_space<vmem>>, %arg4: memref<16x128xf32, #tpu.memory_space<vmem>>) attributes {dimension_semantics = [#tpu.dimension_semantics<parallel>], iteration_bounds = array<i64: 1>, scalar_prefetch = 0 : i64, scratch_operands = 0 : i64, tpu.core_type = #tpu.core_type<tc>, window_params = [{transform_indices = @transform_0, window_bounds = array<i64: 16, 1>}, {transform_indices = @transform_1, window_bounds = array<i64: 16, 128>}, {pipeline_mode = #tpu.pipeline_mode<synchronous>, transform_indices = @transform_2, window_bounds = array<i64: 4, 128>}, {transform_indices = @transform_3, window_bounds = array<i64: 16, 128>}]} {
    %c0 = arith.constant 0 : index
    %c0_0 = arith.constant 0 : index
    %0 = vector.load %arg1[%c0, %c0_0] : memref<16x1xi32, #tpu.memory_space<vmem>>, vector<16x1xi32>
    %c0_1 = arith.constant 0 : index
    %c0_2 = arith.constant 0 : index
    %1 = vector.load %arg2[%c0_1, %c0_2] : memref<16x128xf32, #tpu.memory_space<vmem>>, vector<16x128xf32>
    %c0_3 = arith.constant 0 : index
    %c0_4 = arith.constant 0 : index
    %2 = vector.load %arg3[%c0_3, %c0_4] : memref<4x128xf32, #tpu.memory_space<vmem>>, vector<4x128xf32>
    %3 = vector.extract_strided_slice %2 {offsets = [0, 0], sizes = [1, 128], strides = [1, 1]} : vector<4x128xf32> to vector<1x128xf32>
    %c0_i32 = arith.constant 0 : i32
    %4 = vector.broadcast %c0_i32 : i32 to vector<16x1xi32>
    %5 = arith.cmpi eq, %0, %4 : vector<16x1xi32>
    %cst = arith.constant 0.000000e+00 : f32
    %6 = vector.shape_cast %5 : vector<16x1xi1> to vector<16x1xi1>
    %7 = vector.broadcast %6 : vector<16x1xi1> to vector<16x128xi1>
    %8 = vector.shape_cast %3 : vector<1x128xf32> to vector<1x128xf32>
    %9 = vector.broadcast %8 : vector<1x128xf32> to vector<16x128xf32>
    %10 = vector.broadcast %cst : f32 to vector<16x128xf32>
    %11 = arith.select %7, %9, %10 : vector<16x128xi1>, vector<16x128xf32>
    %12 = arith.addf %1, %11 : vector<16x128xf32>
    %13 = vector.extract_strided_slice %2 {offsets = [1, 0], sizes = [1, 128], strides = [1, 1]} : vector<4x128xf32> to vector<1x128xf32>
    %c1_i32 = arith.constant 1 : i32
    %14 = vector.broadcast %c1_i32 : i32 to vector<16x1xi32>
    %15 = arith.cmpi eq, %0, %14 : vector<16x1xi32>
    %cst_5 = arith.constant 0.000000e+00 : f32
    %16 = vector.shape_cast %15 : vector<16x1xi1> to vector<16x1xi1>
    %17 = vector.broadcast %16 : vector<16x1xi1> to vector<16x128xi1>
    %18 = vector.shape_cast %13 : vector<1x128xf32> to vector<1x128xf32>
    %19 = vector.broadcast %18 : vector<1x128xf32> to vector<16x128xf32>
    %20 = vector.broadcast %cst_5 : f32 to vector<16x128xf32>
    %21 = arith.select %17, %19, %20 : vector<16x128xi1>, vector<16x128xf32>
    %22 = arith.addf %12, %21 : vector<16x128xf32>
    %23 = vector.extract_strided_slice %2 {offsets = [2, 0], sizes = [1, 128], strides = [1, 1]} : vector<4x128xf32> to vector<1x128xf32>
    %c2_i32 = arith.constant 2 : i32
    %24 = vector.broadcast %c2_i32 : i32 to vector<16x1xi32>
    %25 = arith.cmpi eq, %0, %24 : vector<16x1xi32>
    %cst_6 = arith.constant 0.000000e+00 : f32
    %26 = vector.shape_cast %25 : vector<16x1xi1> to vector<16x1xi1>
    %27 = vector.broadcast %26 : vector<16x1xi1> to vector<16x128xi1>
    %28 = vector.shape_cast %23 : vector<1x128xf32> to vector<1x128xf32>
    %29 = vector.broadcast %28 : vector<1x128xf32> to vector<16x128xf32>
    %30 = vector.broadcast %cst_6 : f32 to vector<16x128xf32>
    %31 = arith.select %27, %29, %30 : vector<16x128xi1>, vector<16x128xf32>
    %32 = arith.addf %22, %31 : vector<16x128xf32>
    %33 = vector.extract_strided_slice %2 {offsets = [3, 0], sizes = [1, 128], strides = [1, 1]} : vector<4x128xf32> to vector<1x128xf32>
    %c3_i32 = arith.constant 3 : i32
    %34 = vector.broadcast %c3_i32 : i32 to vector<16x1xi32>
    %35 = arith.cmpi eq, %0, %34 : vector<16x1xi32>
    %cst_7 = arith.constant 0.000000e+00 : f32
    %36 = vector.shape_cast %35 : vector<16x1xi1> to vector<16x1xi1>
    %37 = vector.broadcast %36 : vector<16x1xi1> to vector<16x128xi1>
    %38 = vector.shape_cast %33 : vector<1x128xf32> to vector<1x128xf32>
    %39 = vector.broadcast %38 : vector<1x128xf32> to vector<16x128xf32>
    %40 = vector.broadcast %cst_7 : f32 to vector<16x128xf32>
    %41 = arith.select %37, %39, %40 : vector<16x128xi1>, vector<16x128xf32>
    %42 = arith.addf %32, %41 : vector<16x128xf32>
    %c0_8 = arith.constant 0 : index
    %c0_9 = arith.constant 0 : index
    %43 = vector.load %arg4[%c0_8, %c0_9] : memref<16x128xf32, #tpu.memory_space<vmem>>, vector<16x128xf32>
    tpu.vector_store %arg4[%c0_8, %c0_9], %42 {strides = array<i32>} : memref<16x128xf32, #tpu.memory_space<vmem>>, vector<16x128xf32>,
    return
  }
  func.func @transform_0(%arg0: i32) -> (i32, i32) {
    %c0_i32 = arith.constant 0 : i32
    %c0_i32_0 = arith.constant 0 : i32
    return %arg0, %c0_i32 : i32, i32
  }
  func.func @transform_1(%arg0: i32) -> (i32, i32) {
    %c0_i32 = arith.constant 0 : i32
    %c0_i32_0 = arith.constant 0 : i32
    return %arg0, %c0_i32 : i32, i32
  }
  func.func @transform_2(%arg0: i32) -> (i32, i32) {
    %c0_i32 = arith.constant 0 : i32
    %c0_i32_0 = arith.constant 0 : i32
    %c0_i32_1 = arith.constant 0 : i32
    return %c0_i32, %c0_i32_0 : i32, i32
  }
  func.func @transform_3(%arg0: i32) -> (i32, i32) {
    %c0_i32 = arith.constant 0 : i32
    %c0_i32_0 = arith.constant 0 : i32
    return %arg0, %c0_i32 : i32, i32
  }
}

</mosaic_0001>

<bundles_post_ra>
// kernel: tpu_custom_call.1
= control target key start
LH: loop header
LB: loop body
LE: loop exit
PB: predicated region body
PF: predicated region fallthrough
CT: control target
= control target key end

     0   :  { %v148_v2 = vmov 0   ;;  %s199_s0 = inlined_call_operand.vmem [shape: s32[16,1], index: 0, kind: input, shape index: {}]   ;;  %s200_s1 = inlined_call_operand.vmem [shape: f32[16,128], index: 1, kind: input, shape index: {}]   ;;  %s201_s2 = inlined_call_operand.vmem [shape: f32[4,128], index: 2, kind: input, shape index: {}]   ;;  %s202_s3 = inlined_call_operand.hbm [shape: f32[16,128], index: 3, kind: output, shape index: {}]  }
   0x1   :  { %v15_v0 = vld [vmem:[%s199_s0] sm:$0xff]  ;;  %v16_v1 = vld [vmem:[%s199_s0 + $0x8] sm:$0xff]  ;;  %123 = vset.pattern.permute.xlu1 %v148_v2  ;;  %122 = vset.pattern.permute.xlu0 %v148_v2 }
   0x2   :  { %vm40_vm0 = vcmp.eq.s32.totalorder %v15_v0, 1  ;;  %vm20_vm1 = vcmp.eq.s32.totalorder %v15_v0, 0  ;;  %vm41_vm2 = vcmp.eq.s32.totalorder %v16_v1, 1  ;;  %vm21_vm3 = vcmp.eq.s32.totalorder %v16_v1, 0 }
   0x3   :  { %8 = vsyncpa [#allocation3], 0  ;;  %v42_v3 = vsel %vm40_vm0, 1, %v148_v2  ;;  %v22_v4 = vsel %vm20_vm1, 1, %v148_v2  ;;  %v43_v5 = vsel %vm41_vm2, 1, %v148_v2  ;;  %v23_v6 = vsel %vm21_vm3, 1, %v148_v2 }
   0x4   :  { %45 = vperm.xlu1 %123, %v42_v3   ;;  %25 = vperm.xlu0 %122, %v22_v4   ;;  %vm61_vm4 = vcmp.eq.s32.totalorder %v16_v1, 2  ;;  %vm60_vm5 = vcmp.eq.s32.totalorder %v15_v0, 2  ;;  %vm81_vm6 = vcmp.eq.s32.totalorder %v16_v1, 3  ;;  %vm80_vm7 = vcmp.eq.s32.totalorder %v15_v0, 3  ;;  %v19_v14 = vld [vmem:[%s201_s2] sm:$0xf] }
   0x5   :  { %v63_v7 = vsel %vm61_vm4, 1, %v148_v2  ;;  %v62_v8 = vsel %vm60_vm5, 1, %v148_v2  ;;  %v83_v9 = vsel %vm81_vm6, 1, %v148_v2  ;;  %v82_v10 = vsel %vm80_vm7, 1, %v148_v2  ;;  %v17_v20 = vld [vmem:[%s200_s1] sm:$0xff]  ;;  %v18_v23 = vld [vmem:[%s200_s1 + $0x8] sm:$0xff] }
   0x6   :  { %v32_v11 = vlaneseq  ;;  %s149_s1 = smov [#allocation2]  }
   0x7   :  { %s107_s2 = sshll.u32 %s149_s1, 4  ;;  %s108_s2 = int_to_ptr.vmem [resolvable:$true] %s107_s2 }
   0x8   :  { %48 = vperm.xlu1 %123, %v43_v5   ;;  %28 = vperm.xlu0 %122, %v23_v6   ;;  %v33_v12 = vshrl.u32 %v32_v11, 7  ;;  %s124_s21 = scalar_lea.vmem %s108_s2, 256  ;;  %p129_p1 = scmp.lt.s32.totalorder %s108_s2, %s108_s2 }
   0x9   :  { %p125_p0 = scmp.ne.s32.totalorder %s108_s2, %s124_s21  ;;  %p130_p2 = scmp.lt.s32.totalorder %s124_s21, %s124_s21 }
   0xa   :  { %v34_v13 = vsub.s32 0, %v33_v12  ;;  %v54_v18 = vsub.s32 1, %v33_v12  ;;  %v74_v19 = vsub.s32 2, %v33_v12  ;;  %v94_v28 = vsub.s32 3, %v33_v12 }
   0xb   :  { %p131_p3 = por %p130_p2, %p129_p1 }
   0xc   :  { %68 = vperm.xlu1 %123, %v63_v7   ;;  %65 = vperm.xlu0 %122, %v62_v8   ;;  %v35_v16 = vrot.slane %v19_v14, %v34_v13  ;;  %v55_v25 = vrot.slane %v19_v14, %v54_v18  ;;  %v75_v27 = vrot.slane %v19_v14, %v74_v19 }
   0xd   :  { %v95_v38 = vrot.slane %v19_v14, %v94_v28  ;;  %p132_p4 = pnand %p131_p3, %p125_p0 }
  0x10   :  { %88 = vperm.xlu1 %123, %v83_v9   ;;  %85 = vperm.xlu0 %122, %v82_v10  }
  0x83   :  { %v46_v15 = vpop.permute.xlu1 %45  ;;  %v26_v17 = vpop.permute.xlu0 %25 }
  0x84   :  { %vm30_vm8 = vcmp.eq.s32.totalorder %v26_v17, 1  ;;  %vm50_vm11 = vcmp.eq.s32.totalorder %v46_v15, 1 }
  0x85   :  { %v36_v21 = vsel %vm30_vm8, %v35_v16, 0.0  ;;  %v56_v35 = vsel %vm50_vm11, %v55_v25, 0.0 }
  0x86   :  { %v38_v29 = vadd.f32 %v36_v21, %v17_v20 }
  0x87   :  { %v49_v22 = vpop.permute.xlu1 %48  ;;  %v29_v24 = vpop.permute.xlu0 %28 }
  0x88   :  { %vm51_vm9 = vcmp.eq.s32.totalorder %v49_v22, 1  ;;  %vm31_vm10 = vcmp.eq.s32.totalorder %v29_v24, 1  ;;  %v58_v39 = vadd.f32 %v56_v35, %v38_v29 }
  0x89   :  { %v37_v26 = vsel %vm31_vm10, %v35_v16, 0.0  ;;  %v57_v31 = vsel %vm51_vm9, %v55_v25, 0.0 }
  0x8a   :  { %v39_v30 = vadd.f32 %v37_v26, %v18_v23 }
  0x8b   :  { %v69_v32 = vpop.permute.xlu1 %68  ;;  %v66_v33 = vpop.permute.xlu0 %65 }
  0x8c   :  { %v59_v34 = vadd.f32 %v57_v31, %v39_v30  ;;  %vm71_vm12 = vcmp.eq.s32.totalorder %v69_v32, 1  ;;  %vm70_vm13 = vcmp.eq.s32.totalorder %v66_v33, 1 }
  0x8d   :  { %v77_v36 = vsel %vm71_vm12, %v75_v27, 0.0  ;;  %v76_v37 = vsel %vm70_vm13, %v75_v27, 0.0 }
  0x8e   :  { %v79_v42 = vadd.f32 %v77_v36, %v59_v34  ;;  %v78_v43 = vadd.f32 %v76_v37, %v58_v39 }
  0x8f   :  { %v89_v40 = vpop.permute.xlu1 %88  ;;  %v86_v41 = vpop.permute.xlu0 %85 }
  0x90   :  { %vm91_vm14 = vcmp.eq.s32.totalorder %v89_v40, 1  ;;  %vm90_vm15 = vcmp.eq.s32.totalorder %v86_v41, 1 }
  0x91   :  { %v97_v44 = vsel %vm91_vm14, %v95_v38, 0.0  ;;  %v96_v45 = vsel %vm90_vm15, %v95_v38, 0.0 }
  0x92   :  { %v99_v46 = vadd.f32 %v97_v44, %v79_v42  ;;  %v98_v47 = vadd.f32 %v96_v45, %v78_v43 }
  0x94   :  { %101 = vst [vmem:[#allocation2 + $0x8] sm:$0xff] %v99_v46  ;;  %100 = vst [vmem:[#allocation2] sm:$0xff] %v98_v47 }
  0x95   :  { %135 = shalt.err (!%p132_p4)
}
  0x96   :  { %s136_s24 = scalar_lea.hbm %s202_s3, 256 }
  0x97   :  { %p137_p5 = scmp.ne.s32.totalorder %s202_s3, %s136_s24  ;;  %p140_p6 = scmp.lt.u32.totalorder %s136_s24, %s202_s3 }
  0x99   :  { %p142_p7 = pnand %p140_p6, %p137_p5 }
  0x9b   :  { %145 = shalt.err (!%p142_p7)
}
  0x9c   :  { %s150_s29 = smov 128   ;;  %s151_s30 = smov 8  }
  0x9d   :  { %113 = dma.vmem_to_hbm [thread:$0]  %s108_s2, 256, %s202_s3, [#allocation3], %s150_s29, %s150_s29, %s151_s30  }
  0x9e   :  { %146 = dma.done.wait [#allocation3], 256  }
  0x9f   :  { %147 = vsyncadd [#allocation3], 4294967040 }
  0xa0   :  { %117 = vsyncpa [#allocation3], 1 }

</bundles_post_ra>
